<compile_context>
chip_gen: v7x
topology: tpu7x:2x2x1
jax: 0.10.0
libtpu: 0.0.40
codegen_flags: <defaults>
</compile_context>

<pallas_src>
import functools

import jax
import jax.numpy as jnp
from jax.experimental import pallas as pl
from jax.experimental.pallas import tpu as pltpu

LANE = 128      # vreg lane width
SUBLANE = 8     # vreg sublane count (f32)


def _round_up(v, m):
    return ((v + m - 1) // m) * m


def _qnet_kernel(x_ref, w1_ref, b1_ref, w2_ref, b2_ref, o_ref):
    # Hidden layer: MXU matmul in the input's native dtype, f32 accumulation.
    h = jnp.dot(x_ref[...], w1_ref[...], preferred_element_type=jnp.float32)
    # Bias + ReLU on the f32 accumulator (f32 VPU path works on all TPU gens).
    h = jnp.maximum(h + b1_ref[...], 0.0)
    # Output layer: cast activations to the weight dtype for the MXU, accumulate f32.
    out = jnp.dot(h.astype(w2_ref.dtype), w2_ref[...],
                  preferred_element_type=jnp.float32)
    # Store only the true O columns (block last dim == full array dim, so this is
    # a legal, narrow writeback — no padded lanes ever hit HBM).
    o_ref[...] = (out + b2_ref[...]).astype(o_ref.dtype)


@functools.partial(jax.jit, static_argnames=("block_b",))
def linear_qnet_forward(x, w1, b1, w2, b2, *, block_b=4096):
    """Fused 2-layer MLP forward pass.

    x:  (B, input_size)
    w1: (input_size, hidden_size), b1: (hidden_size,) or (1, hidden_size)
    w2: (hidden_size, output_size), b2: (output_size,) or (1, output_size)
    returns (B, output_size), same dtype as x.
    """
    B, I = x.shape
    H = w1.shape[1]
    O = w2.shape[1]
    out_dtype = x.dtype

    # Normalize biases to 2-D (1, F) and keep the bias-add in f32.
    b1 = jnp.asarray(b1).reshape(1, H).astype(jnp.float32)
    b2 = jnp.asarray(b2).reshape(1, O).astype(jnp.float32)

    # ---- Batch tiling ----
    # TB is a multiple of 8 sublanes, at most block_b, and capped so the grid has
    # at least 2 steps whenever B allows it (keeps both v7x TensorCores busy).
    # No wrapper-side padding of x: the ragged boundary block is masked by Pallas.
    TB = max(SUBLANE, min(_round_up(block_b, SUBLANE),
                          _round_up(pl.cdiv(B, 2), SUBLANE)))
    grid = (pl.cdiv(B, TB),)

    flops = 2 * B * (I * H + H * O)
    bytes_accessed = (
        x.size * x.dtype.itemsize
        + w1.size * w1.dtype.itemsize + b1.size * b1.dtype.itemsize
        + w2.size * w2.dtype.itemsize + b2.size * b2.dtype.itemsize
        + B * O * jnp.dtype(out_dtype).itemsize
    )

    return pl.pallas_call(
        _qnet_kernel,
        out_shape=jax.ShapeDtypeStruct((B, O), out_dtype),
        grid=grid,
        in_specs=[
            pl.BlockSpec((TB, I), lambda i: (i, 0)),   # x: streamed per batch tile
            pl.BlockSpec((I, H), lambda i: (0, 0)),    # w1: VMEM-resident
            pl.BlockSpec((1, H), lambda i: (0, 0)),    # b1: VMEM-resident
            pl.BlockSpec((H, O), lambda i: (0, 0)),    # w2: VMEM-resident
            pl.BlockSpec((1, O), lambda i: (0, 0)),    # b2: VMEM-resident
        ],
        out_specs=pl.BlockSpec((TB, O), lambda i: (i, 0)),
        compiler_params=pltpu.CompilerParams(
            dimension_semantics=("parallel",),         # shard batch tiles across TCs (v7x)
        ),
        cost_estimate=pl.CostEstimate(
            flops=flops, transcendentals=0, bytes_accessed=bytes_accessed),
    )(x, w1, b1, w2, b2)


def init_params(key, input_size, hidden_size, output_size, dtype=jnp.float32):
    """Deterministic init mimicking nn.Linear's uniform(-1/sqrt(fan_in), 1/sqrt(fan_in))."""
    k1, k2, k3, k4 = jax.random.split(key, 4)
    bound1 = 1.0 / (input_size ** 0.5)
    bound2 = 1.0 / (hidden_size ** 0.5)
    w1 = jax.random.uniform(k1, (input_size, hidden_size), dtype, -bound1, bound1)
    b1 = jax.random.uniform(k2, (hidden_size,), dtype, -bound1, bound1)
    w2 = jax.random.uniform(k3, (hidden_size, output_size), dtype, -bound2, bound2)
    b2 = jax.random.uniform(k4, (output_size,), dtype, -bound2, bound2)
    return w1, b1, w2, b2


if __name__ == "__main__":
    key = jax.random.PRNGKey(0)
    k_x, k_p = jax.random.split(key)

    batch, input_size, hidden_size, output_size = 8, 16, 32, 4
    x = jax.random.normal(k_x, (batch, input_size), dtype=jnp.float32)
    w1, b1, w2, b2 = init_params(k_p, input_size, hidden_size, output_size)

    # Native-dtype (f32) path, tile-aligned batch.
    out = jax.block_until_ready(linear_qnet_forward(x, w1, b1, w2, b2))
    ref = jnp.maximum(x @ w1 + b1[None, :], 0.0) @ w2 + b2[None, :]
    assert out.shape == (batch, output_size)
    assert jnp.allclose(out, ref, atol=1e-5, rtol=1e-5), float(jnp.max(jnp.abs(out - ref)))

    # Non-tile-aligned (ragged) batch to exercise the masked boundary block.
    x2 = jax.random.normal(k_x, (37, input_size), dtype=jnp.float32)
    out2 = jax.block_until_ready(linear_qnet_forward(x2, w1, b1, w2, b2))
    ref2 = jnp.maximum(x2 @ w1 + b1[None, :], 0.0) @ w2 + b2[None, :]
    assert out2.shape == (37, output_size)
    assert jnp.allclose(out2, ref2, atol=1e-5, rtol=1e-5), float(jnp.max(jnp.abs(out2 - ref2)))

    print("KERNEL_OK")
</pallas_src>

<mosaic_0001>
module attributes {stable_mosaic.version = 11 : i64} {
  func.func @_qnet_kernel(%arg0: i32, %arg1: memref<8x16xf32, #tpu.memory_space<vmem>>, %arg2: memref<16x32xf32, #tpu.memory_space<vmem>>, %arg3: memref<1x32xf32, #tpu.memory_space<vmem>>, %arg4: memref<32x4xf32, #tpu.memory_space<vmem>>, %arg5: memref<1x4xf32, #tpu.memory_space<vmem>>, %arg6: memref<8x4xf32, #tpu.memory_space<vmem>>) attributes {dimension_semantics = [#tpu.dimension_semantics<parallel>], iteration_bounds = array<i64: 1>, scalar_prefetch = 0 : i64, scratch_operands = 0 : i64, tpu.core_type = #tpu.core_type<tc>, window_params = [{transform_indices = @transform_0, window_bounds = array<i64: 8, 16>}, {pipeline_mode = #tpu.pipeline_mode<synchronous>, transform_indices = @transform_1, window_bounds = array<i64: 16, 32>}, {pipeline_mode = #tpu.pipeline_mode<synchronous>, transform_indices = @transform_2, window_bounds = array<i64: 1, 32>}, {pipeline_mode = #tpu.pipeline_mode<synchronous>, transform_indices = @transform_3, window_bounds = array<i64: 32, 4>}, {pipeline_mode = #tpu.pipeline_mode<synchronous>, transform_indices = @transform_4, window_bounds = array<i64: 1, 4>}, {transform_indices = @transform_5, window_bounds = array<i64: 8, 4>}]} {
    %c0 = arith.constant 0 : index
    %c0_0 = arith.constant 0 : index
    %0 = vector.load %arg1[%c0, %c0_0] : memref<8x16xf32, #tpu.memory_space<vmem>>, vector<8x16xf32>
    %c0_1 = arith.constant 0 : index
    %c0_2 = arith.constant 0 : index
    %1 = vector.load %arg2[%c0_1, %c0_2] : memref<16x32xf32, #tpu.memory_space<vmem>>, vector<16x32xf32>
    %cst = arith.constant dense<0.000000e+00> : vector<8x32xf32>
    %2 = tpu.matmul %0, %1, %cst {dimension_numbers = #tpu.dot_dimension_numbers<[1], [0], [0], [1], [0, 0, 1, 1], [], []>} : vector<8x16xf32>, vector<16x32xf32>, vector<8x32xf32> -> vector<8x32xf32>
    %c0_3 = arith.constant 0 : index
    %c0_4 = arith.constant 0 : index
    %3 = vector.load %arg3[%c0_3, %c0_4] : memref<1x32xf32, #tpu.memory_space<vmem>>, vector<1x32xf32>
    %4 = vector.broadcast %3 : vector<1x32xf32> to vector<8x32xf32>
    %5 = arith.addf %2, %4 : vector<8x32xf32>
    %cst_5 = arith.constant 0.000000e+00 : f32
    %6 = vector.broadcast %cst_5 : f32 to vector<8x32xf32>
    %7 = arith.maximumf %5, %6 : vector<8x32xf32>
    %c0_6 = arith.constant 0 : index
    %c0_7 = arith.constant 0 : index
    %8 = vector.load %arg4[%c0_6, %c0_7] : memref<32x4xf32, #tpu.memory_space<vmem>>, vector<32x4xf32>
    %cst_8 = arith.constant dense<0.000000e+00> : vector<8x4xf32>
    %9 = tpu.matmul %7, %8, %cst_8 {dimension_numbers = #tpu.dot_dimension_numbers<[1], [0], [0], [1], [0, 0, 1, 1], [], []>} : vector<8x32xf32>, vector<32x4xf32>, vector<8x4xf32> -> vector<8x4xf32>
    %c0_9 = arith.constant 0 : index
    %c0_10 = arith.constant 0 : index
    %10 = vector.load %arg5[%c0_9, %c0_10] : memref<1x4xf32, #tpu.memory_space<vmem>>, vector<1x4xf32>
    %11 = vector.broadcast %10 : vector<1x4xf32> to vector<8x4xf32>
    %12 = arith.addf %9, %11 : vector<8x4xf32>
    %c0_11 = arith.constant 0 : index
    %c0_12 = arith.constant 0 : index
    %13 = vector.load %arg6[%c0_11, %c0_12] : memref<8x4xf32, #tpu.memory_space<vmem>>, vector<8x4xf32>
    tpu.vector_store %arg6[%c0_11, %c0_12], %12 {strides = array<i32>} : memref<8x4xf32, #tpu.memory_space<vmem>>, vector<8x4xf32>,
    return
  }
  func.func @transform_0(%arg0: i32) -> (i32, i32) {
    %c0_i32 = arith.constant 0 : i32
    %c0_i32_0 = arith.constant 0 : i32
    return %arg0, %c0_i32 : i32, i32
  }
  func.func @transform_1(%arg0: i32) -> (i32, i32) {
    %c0_i32 = arith.constant 0 : i32
    %c0_i32_0 = arith.constant 0 : i32
    %c0_i32_1 = arith.constant 0 : i32
    return %c0_i32, %c0_i32_0 : i32, i32
  }
  func.func @transform_2(%arg0: i32) -> (i32, i32) {
    %c0_i32 = arith.constant 0 : i32
    %c0_i32_0 = arith.constant 0 : i32
    %c0_i32_1 = arith.constant 0 : i32
    return %c0_i32, %c0_i32_0 : i32, i32
  }
  func.func @transform_3(%arg0: i32) -> (i32, i32) {
    %c0_i32 = arith.constant 0 : i32
    %c0_i32_0 = arith.constant 0 : i32
    %c0_i32_1 = arith.constant 0 : i32
    return %c0_i32, %c0_i32_0 : i32, i32
  }
  func.func @transform_4(%arg0: i32) -> (i32, i32) {
    %c0_i32 = arith.constant 0 : i32
    %c0_i32_0 = arith.constant 0 : i32
    %c0_i32_1 = arith.constant 0 : i32
    return %c0_i32, %c0_i32_0 : i32, i32
  }
  func.func @transform_5(%arg0: i32) -> (i32, i32) {
    %c0_i32 = arith.constant 0 : i32
    %c0_i32_0 = arith.constant 0 : i32
    return %arg0, %c0_i32 : i32, i32
  }
}

</mosaic_0001>

<bundles_post_ra>
// kernel: linear_qnet_forward.1
= control target key start
LH: loop header
LB: loop body
LE: loop exit
PB: predicated region body
PF: predicated region fallthrough
CT: control target
= control target key end

     0   :  { %v238_v0 = vmov 0.0|0.0   ;;  %vm239_vm0 = vmmov 0   ;;  %v240_v3 = vmov 0.0   ;;  %vm30_vm1 = vcmask 130048   ;;  %s301_s1 = inlined_call_operand.vmem [shape: f32[16,32], index: 1, kind: input, shape index: {}]   ;;  %s302_s3 = inlined_call_operand.vmem [shape: f32[32,4], index: 3, kind: input, shape index: {}]   ;;  %s303_s0 = inlined_call_operand.vmem [shape: f32[8,16], index: 0, kind: input, shape index: {}]   ;;  %s304_s2 = inlined_call_operand.vmem [shape: f32[1,32], index: 2, kind: input, shape index: {}]   ;;  %s305_s4 = inlined_call_operand.vmem [shape: f32[1,4], index: 4, kind: input, shape index: {}]   ;;  %s306_s5 = inlined_call_operand.vmem [shape: f32[8,4], index: 5, kind: output, shape index: {}]  }
   0x1   :  { %226 = vmatprep.subr.bf16.mxu0 %v238_v0  ;;  %v21_v1 = vld [vmem:[%s301_s1] sm:$0xff]  ;;  %v22_v2 = vld [vmem:[%s301_s1 + $0x8] sm:$0xff]  ;;  %212 = vmatprep.mubr.msk.f32.mxu0 %vm239_vm0, %v240_v3  ;;  %v107_v9 = vld [vmem:[%s302_s3 + $0x10] sm:$0xff]  ;;  %vm116_vm2 = vcmask 261120   ;;  %vm190_vm3 = vcmask 31744  }
   0x2   :  { %v227_v4 = vpack.c.bf16 %v22_v2, %v21_v1  ;;  %229 = vmatprep.subr.bf16.mxu1 %v238_v0  ;;  %v105_v5 = vld [vmem:[%s302_s3] sm:$0xff]  ;;  %v106_v6 = vld [vmem:[%s302_s3 + $0x8] sm:$0xff]  ;;  %223 = vmatprep.mubr.msk.f32.mxu1 %vm239_vm0, %v240_v3  ;;  %v108_v10 = vld [vmem:[%s302_s3 + $0x18] sm:$0xff] }
   0x3   :  { %v230_v7 = vpack.c.bf16 %v106_v6, %v105_v5  ;;  %v20_v8 = vld [vmem:[%s303_s0] sm:$0xff]  ;;  %v233_v11 = vpack.c.bf16 %v108_v10, %v107_v9 }
   0x4   :  { %228 = vmatpush3.bf16.msra.mxu0 %v227_v4  ;;  %v196_v12 = vld [vmem:[%s304_s2] ss:$0 sm:$0xff] }
   0x5   :  { %231 = vmatpush3.bf16.msra.mxu1 %v230_v7  ;;  %v198_v17 = vld [vmem:[%s305_s4] ss:$0 sm:$0xff] }
   0x6   :  { %232 = vmatprep.subr.bf16.mxu1 %v238_v0 }
   0x7   :  { %213 = vmatmul.mubr.msk.f32.vlgmr.msra.gmra.mrb[0].mxu0 %vm30_vm1, %v20_v8 }
   0x9   :  { %234 = vmatpush3.bf16.msra.mxu1 %v233_v11 }
  0xda   :  { %v100_v13 = vpop.f32.mrb[0].mxu0 }
  0xdb   :  { %v101_v14 = vadd.f32 %v196_v12, %v100_v13  ;;  %v214_v15 = vpop.f32.mrb[1].mxu0 }
  0xdd   :  { %v104_v16 = vmax.f32 %v101_v14, 0.0 }
  0xdf   :  { %224 = vmatmul.mubr.msk.f32.vlgmr.msra.gmra.mrb[0].mxu1 %vm116_vm2, %v104_v16 }
 0x1b2   :  { %v186_v18 = vpop.f32.mrb[0].mxu1 }
 0x1b3   :  { %v187_v19 = vadd.f32 %v198_v17, %v186_v18  ;;  %v225_v20 = vpop.f32.mrb[1].mxu1 }
 0x1b5   :  { %191 = vst.msk [vmem:[%s306_s5] sm:$0xff] %vm190_vm3, %v187_v19 }

</bundles_post_ra>
